<compile_context>
chip_gen: v6e
topology: v6e:2x2x1
jax: 0.10.0
libtpu: 0.0.40
codegen_flags: <defaults>
</compile_context>

<pallas_src>
import functools

import jax
import jax.numpy as jnp
from jax import lax
from jax.experimental import pallas as pl
from jax.experimental.pallas import tpu as pltpu


def _round_up(x, m):
    return (x + m - 1) // m * m


def _capsule_kernel(f_ref, w_ref, r_ref, o_ref, *,
                    T1, Z1, K, WP, LC, C0, KKC0P, exact):
    # f_ref: (C0, FP)   zero-padded, spatially-flattened input for one batch
    #                   element (flat index = y*WP + x over the padded image)
    # w_ref: (O, KKC0P) fused conv weights for all t_0 capsule types
    # r_ref: (1, LC)    routing coefficient 1/(t_1 * window_count) per column
    # o_ref: (O, LC)    squashed capsule output (columns j = y*WP + x)
    f = f_ref[...].astype(jnp.float32)                       # (C0, FP)

    # Build the im2col patch tile in VMEM from K*K statically shifted slices
    # of the flattened input.  These are VMEM-local copies/rotations; HBM only
    # ever sees the input once.
    pieces = []
    for kh in range(K):
        for kw in range(K):
            off = kh * WP + kw
            pieces.append(f[:, off:off + LC])                # (C0, LC)
    pad_rows = KKC0P - K * K * C0
    if pad_rows:
        pieces.append(jnp.zeros((pad_rows, LC), jnp.float32))
    patches = jnp.concatenate(pieces, axis=0)                # (KKC0P, LC)

    # One fused MXU matmul, f32 accumulation.
    acc = jnp.dot(w_ref[...], patches.astype(w_ref.dtype),
                  preferred_element_type=jnp.float32)        # (O, LC)
    p = acc * r_ref[...]                                     # routing coeff.

    # Squash per capsule type: all rsqrt/reciprocal work happens on the narrow
    # (1, LC) scale vector; each Z1-row group is stored directly into o_ref.
    for t in range(T1):
        ps = p[t * Z1:(t + 1) * Z1, :]                       # (Z1, LC)
        pns = jnp.sum(ps * ps, axis=0, keepdims=True)        # (1, LC)
        scale = (pns * lax.rsqrt(pns + 1e-9)
                 * pl.reciprocal(1.0 + pns, approx=not exact))
        o_ref[t * Z1:(t + 1) * Z1, :] = (ps * scale).astype(o_ref.dtype)


def capsule_layer_forward(u, weights, *, t_1, z_1, k=5, s=1, routing=3,
                          op="conv", compute_dtype=jnp.bfloat16):
    """Pallas implementation of CapsuleLayer.forward (op='conv', s=1).

    compute_dtype=jnp.bfloat16 (default) feeds the MXU native bf16 operands
    with f32 accumulation; pass jnp.float32 for bit-tight agreement with the
    f32 reference.
    """
    if op != "conv" or s != 1:
        # TODO(synk): 'deconv' (ConvTranspose2d) branch and stride != 1 not implemented.
        raise NotImplementedError("only op='conv', s=1 is implemented")
    N, t_0, z_0, H, W = u.shape
    if len(weights) != t_0:
        raise ValueError("Wrong type of operation for capsule")

    cdt = jnp.dtype(compute_dtype)
    pad = 2                                   # module hard-codes padding=2
    Hp, Wp = H + 2 * pad, W + 2 * pad
    H1, W1 = Hp - k + 1, Wp - k + 1           # = H, W for k=5
    C0 = t_0 * z_0
    O = t_1 * z_1
    KKC0 = k * k * C0
    sub = 16 if cdt == jnp.bfloat16 else 8
    KKC0p = _round_up(KKC0, sub)              # bf16: 200 -> 208

    # Lane-dense column count per batch element (columns j = y*Wp + x) and the
    # flattened-input length needed so every tap slice stays in bounds.
    LC = _round_up(H1 * Wp, 128)
    max_off = (k - 1) * (Wp + 1)
    FP = _round_up(max(Hp * Wp, LC + max_off), 128)

    # ---- small layout plumbing on the raw input only (no im2col in HBM) ----
    up = jnp.pad(u.reshape(N, C0, H, W),
                 ((0, 0), (0, 0), (pad, pad), (pad, pad)))
    up = up.reshape(N, C0, Hp * Wp)
    up = jnp.pad(up, ((0, 0), (0, 0), (0, FP - Hp * Wp))).astype(cdt)

    w = jnp.stack(weights, axis=0)                           # (t_0, O, z_0, k, k)
    w_flat = jnp.transpose(w, (1, 3, 4, 0, 2)).reshape(O, KKC0)
    w_flat = jnp.pad(w_flat, ((0, 0), (0, KKC0p - KKC0))).astype(cdt)

    # Routing coefficient r = 1/(t_1 * count): input-independent (b stays 0 in
    # the reference), so it is precomputed once here.
    same_pad = (k - 1) // 2
    dn = ("NCHW", "OIHW", "NCHW")
    count = lax.conv_general_dilated(
        jnp.ones((1, 1, H1, W1), jnp.float32),
        jnp.ones((1, 1, k, k), jnp.float32),
        (1, 1), ((same_pad, same_pad), (same_pad, same_pad)),
        dimension_numbers=dn)[0, 0]                          # (H1, W1)
    r2d = 1.0 / (t_1 * count)
    r2d = jnp.pad(r2d, ((0, 0), (0, Wp - W1)), constant_values=1.0)  # (H1, Wp)
    r = jnp.pad(r2d.reshape(1, H1 * Wp), ((0, 0), (0, LC - H1 * Wp)),
                constant_values=1.0).astype(jnp.float32)

    kernel = functools.partial(
        _capsule_kernel, T1=t_1, Z1=z_1, K=k, WP=Wp, LC=LC, C0=C0,
        KKC0P=KKC0p, exact=(cdt == jnp.float32))

    out = pl.pallas_call(
        kernel,
        out_shape=jax.ShapeDtypeStruct((N, O, LC), jnp.float32),
        grid_spec=pltpu.PrefetchScalarGridSpec(
            num_scalar_prefetch=0,
            grid=(N,),
            in_specs=[
                pl.BlockSpec((None, C0, FP), lambda n: (n, 0, 0)),
                pl.BlockSpec((O, KKC0p), lambda n: (0, 0)),
                pl.BlockSpec((1, LC), lambda n: (0, 0)),
            ],
            out_specs=pl.BlockSpec((None, O, LC), lambda n: (n, 0, 0)),
        ),
        compiler_params=pltpu.CompilerParams(
            dimension_semantics=("parallel",)),
    )(up, w_flat, r)

    # Strip the column padding; output is already (N, O, ...) so no transpose.
    v = out[:, :, :H1 * Wp].reshape(N, O, H1, Wp)[:, :, :, :W1]
    return v.reshape(N, t_1, z_1, H1, W1)


def reference_forward(u, weights, *, t_1, z_1, k):
    """Pure-JAX reference reproducing the PyTorch module's forward values."""
    N, t_0, z_0, H, W = u.shape
    pad = 2
    dn = ("NCHW", "OIHW", "NCHW")
    u_hat_sum = jnp.zeros((N, t_1 * z_1, H, W), jnp.float32)
    for i in range(t_0):
        y = lax.conv_general_dilated(u[:, i], weights[i], (1, 1),
                                     ((pad, pad), (pad, pad)),
                                     dimension_numbers=dn)
        u_hat_sum = u_hat_sum + y
    u_hat_sum = u_hat_sum.reshape(N, t_1, z_1, H, W)
    count = lax.conv_general_dilated(jnp.ones((1, 1, H, W), jnp.float32),
                                     jnp.ones((1, 1, k, k), jnp.float32),
                                     (1, 1), ((pad, pad), (pad, pad)),
                                     dimension_numbers=dn)[0, 0]
    p = u_hat_sum * (1.0 / (t_1 * count))
    pns = jnp.sum(p * p, axis=2, keepdims=True)
    pn = jnp.sqrt(pns + 1e-9)
    return pns / (1.0 + pns) * p / pn


if __name__ == "__main__":
    key = jax.random.PRNGKey(0)
    N, t_0, z_0, t_1, z_1 = 2, 2, 4, 2, 8
    H = W = 16
    k = 5

    k_in, k_w = jax.random.split(key)
    u = jax.random.normal(k_in, (N, t_0, z_0, H, W), jnp.float32)
    w_keys = jax.random.split(k_w, t_0)
    # t_0 conv weight banks, each (t_1*z_1, z_0, k, k), deterministic init
    weights = [0.1 * jax.random.normal(wk, (t_1 * z_1, z_0, k, k), jnp.float32)
               for wk in w_keys]

    v_ref = reference_forward(u, weights, t_1=t_1, z_1=z_1, k=k)

    # Exact f32 path: tight check against the f32 reference.
    v32 = jax.block_until_ready(
        capsule_layer_forward(u, weights, t_1=t_1, z_1=z_1, k=k,
                              compute_dtype=jnp.float32))
    assert v32.shape == (N, t_1, z_1, H, W), v32.shape
    err32 = float(jnp.max(jnp.abs(v32 - v_ref)))
    assert jnp.allclose(v32, v_ref, atol=1e-4, rtol=1e-4), err32

    # Production default (bf16 MXU inputs, f32 accumulation): relaxed tolerance.
    vbf = jax.block_until_ready(
        capsule_layer_forward(u, weights, t_1=t_1, z_1=z_1, k=k))
    assert vbf.shape == (N, t_1, z_1, H, W), vbf.shape
    errbf = float(jnp.max(jnp.abs(vbf - v_ref)))
    assert jnp.allclose(vbf, v_ref, atol=2e-2, rtol=2e-2), errbf

    print("KERNEL_OK")
</pallas_src>

<mosaic_0001>
module attributes {stable_mosaic.version = 11 : i64} {
  func.func @_capsule_kernel(%arg0: i32, %arg1: memref<1x8x512xf32, #tpu.memory_space<vmem>>, %arg2: memref<16x200xf32, #tpu.memory_space<vmem>>, %arg3: memref<1x384xf32, #tpu.memory_space<vmem>>, %arg4: memref<1x16x384xf32, #tpu.memory_space<vmem>>) attributes {dimension_semantics = [#tpu.dimension_semantics<parallel>], iteration_bounds = array<i64: 2>, scalar_prefetch = 0 : i64, scratch_operands = 0 : i64, tpu.core_type = #tpu.core_type<tc>, window_params = [{transform_indices = @transform_0, window_bounds = array<i64: 1, 8, 512>}, {pipeline_mode = #tpu.pipeline_mode<synchronous>, transform_indices = @transform_1, window_bounds = array<i64: 16, 200>}, {pipeline_mode = #tpu.pipeline_mode<synchronous>, transform_indices = @transform_2, window_bounds = array<i64: 1, 384>}, {transform_indices = @transform_3, window_bounds = array<i64: 1, 16, 384>}]} {
    %c0 = arith.constant 0 : index
    %c0_0 = arith.constant 0 : index
    %c0_1 = arith.constant 0 : index
    %0 = vector.load %arg1[%c0, %c0_0, %c0_1] : memref<1x8x512xf32, #tpu.memory_space<vmem>>, vector<1x8x512xf32>
    %1 = vector.shape_cast %0 : vector<1x8x512xf32> to vector<8x512xf32>
    %2 = vector.extract_strided_slice %1 {offsets = [0, 0], sizes = [8, 384], strides = [1, 1]} : vector<8x512xf32> to vector<8x384xf32>
    %3 = vector.extract_strided_slice %1 {offsets = [0, 1], sizes = [8, 384], strides = [1, 1]} : vector<8x512xf32> to vector<8x384xf32>
    %4 = vector.extract_strided_slice %1 {offsets = [0, 2], sizes = [8, 384], strides = [1, 1]} : vector<8x512xf32> to vector<8x384xf32>
    %5 = vector.extract_strided_slice %1 {offsets = [0, 3], sizes = [8, 384], strides = [1, 1]} : vector<8x512xf32> to vector<8x384xf32>
    %6 = vector.extract_strided_slice %1 {offsets = [0, 4], sizes = [8, 384], strides = [1, 1]} : vector<8x512xf32> to vector<8x384xf32>
    %7 = vector.extract_strided_slice %1 {offsets = [0, 20], sizes = [8, 384], strides = [1, 1]} : vector<8x512xf32> to vector<8x384xf32>
    %8 = vector.extract_strided_slice %1 {offsets = [0, 21], sizes = [8, 384], strides = [1, 1]} : vector<8x512xf32> to vector<8x384xf32>
    %9 = vector.extract_strided_slice %1 {offsets = [0, 22], sizes = [8, 384], strides = [1, 1]} : vector<8x512xf32> to vector<8x384xf32>
    %10 = vector.extract_strided_slice %1 {offsets = [0, 23], sizes = [8, 384], strides = [1, 1]} : vector<8x512xf32> to vector<8x384xf32>
    %11 = vector.extract_strided_slice %1 {offsets = [0, 24], sizes = [8, 384], strides = [1, 1]} : vector<8x512xf32> to vector<8x384xf32>
    %12 = vector.extract_strided_slice %1 {offsets = [0, 40], sizes = [8, 384], strides = [1, 1]} : vector<8x512xf32> to vector<8x384xf32>
    %13 = vector.extract_strided_slice %1 {offsets = [0, 41], sizes = [8, 384], strides = [1, 1]} : vector<8x512xf32> to vector<8x384xf32>
    %14 = vector.extract_strided_slice %1 {offsets = [0, 42], sizes = [8, 384], strides = [1, 1]} : vector<8x512xf32> to vector<8x384xf32>
    %15 = vector.extract_strided_slice %1 {offsets = [0, 43], sizes = [8, 384], strides = [1, 1]} : vector<8x512xf32> to vector<8x384xf32>
    %16 = vector.extract_strided_slice %1 {offsets = [0, 44], sizes = [8, 384], strides = [1, 1]} : vector<8x512xf32> to vector<8x384xf32>
    %17 = vector.extract_strided_slice %1 {offsets = [0, 60], sizes = [8, 384], strides = [1, 1]} : vector<8x512xf32> to vector<8x384xf32>
    %18 = vector.extract_strided_slice %1 {offsets = [0, 61], sizes = [8, 384], strides = [1, 1]} : vector<8x512xf32> to vector<8x384xf32>
    %19 = vector.extract_strided_slice %1 {offsets = [0, 62], sizes = [8, 384], strides = [1, 1]} : vector<8x512xf32> to vector<8x384xf32>
    %20 = vector.extract_strided_slice %1 {offsets = [0, 63], sizes = [8, 384], strides = [1, 1]} : vector<8x512xf32> to vector<8x384xf32>
    %21 = vector.extract_strided_slice %1 {offsets = [0, 64], sizes = [8, 384], strides = [1, 1]} : vector<8x512xf32> to vector<8x384xf32>
    %22 = vector.extract_strided_slice %1 {offsets = [0, 80], sizes = [8, 384], strides = [1, 1]} : vector<8x512xf32> to vector<8x384xf32>
    %23 = vector.extract_strided_slice %1 {offsets = [0, 81], sizes = [8, 384], strides = [1, 1]} : vector<8x512xf32> to vector<8x384xf32>
    %24 = vector.extract_strided_slice %1 {offsets = [0, 82], sizes = [8, 384], strides = [1, 1]} : vector<8x512xf32> to vector<8x384xf32>
    %25 = vector.extract_strided_slice %1 {offsets = [0, 83], sizes = [8, 384], strides = [1, 1]} : vector<8x512xf32> to vector<8x384xf32>
    %26 = vector.extract_strided_slice %1 {offsets = [0, 84], sizes = [8, 384], strides = [1, 1]} : vector<8x512xf32> to vector<8x384xf32>
    %27 = tpu.concatenate %2, %3, %4, %5, %6, %7, %8, %9, %10, %11, %12, %13, %14, %15, %16, %17 in 0 : vector<8x384xf32>, vector<8x384xf32>, vector<8x384xf32>, vector<8x384xf32>, vector<8x384xf32>, vector<8x384xf32>, vector<8x384xf32>, vector<8x384xf32>, vector<8x384xf32>, vector<8x384xf32>, vector<8x384xf32>, vector<8x384xf32>, vector<8x384xf32>, vector<8x384xf32>, vector<8x384xf32>, vector<8x384xf32> -> vector<128x384xf32>
    %28 = tpu.concatenate %18, %19, %20, %21, %22, %23, %24, %25, %26 in 0 : vector<8x384xf32>, vector<8x384xf32>, vector<8x384xf32>, vector<8x384xf32>, vector<8x384xf32>, vector<8x384xf32>, vector<8x384xf32>, vector<8x384xf32>, vector<8x384xf32> -> vector<72x384xf32>
    %29 = tpu.concatenate %27, %28 in 0 : vector<128x384xf32>, vector<72x384xf32> -> vector<200x384xf32>
    %c0_2 = arith.constant 0 : index
    %c0_3 = arith.constant 0 : index
    %30 = vector.load %arg2[%c0_2, %c0_3] : memref<16x200xf32, #tpu.memory_space<vmem>>, vector<16x200xf32>
    %cst = arith.constant dense<0.000000e+00> : vector<16x384xf32>
    %31 = tpu.matmul %30, %29, %cst {dimension_numbers = #tpu.dot_dimension_numbers<[1], [0], [0], [1], [0, 0, 1, 1], [], []>} : vector<16x200xf32>, vector<200x384xf32>, vector<16x384xf32> -> vector<16x384xf32>
    %c0_4 = arith.constant 0 : index
    %c0_5 = arith.constant 0 : index
    %32 = vector.load %arg3[%c0_4, %c0_5] : memref<1x384xf32, #tpu.memory_space<vmem>>, vector<1x384xf32>
    %33 = vector.broadcast %32 : vector<1x384xf32> to vector<16x384xf32>
    %34 = arith.mulf %31, %33 : vector<16x384xf32>
    %35 = vector.extract_strided_slice %34 {offsets = [0, 0], sizes = [8, 384], strides = [1, 1]} : vector<16x384xf32> to vector<8x384xf32>
    %36 = arith.mulf %35, %35 : vector<8x384xf32>
    %cst_6 = arith.constant dense<0.000000e+00> : vector<384xf32>
    %37 = vector.multi_reduction <add>, %36, %cst_6 [0] : vector<8x384xf32> to vector<384xf32>
    %38 = vector.shape_cast %37 : vector<384xf32> to vector<1x384xf32>
    %cst_7 = arith.constant 9.99999971E-10 : f32
    %39 = vector.broadcast %cst_7 : f32 to vector<1x384xf32>
    %40 = arith.addf %38, %39 : vector<1x384xf32>
    %41 = math.rsqrt %40 : vector<1x384xf32>
    %42 = arith.mulf %38, %41 : vector<1x384xf32>
    %cst_8 = arith.constant 1.000000e+00 : f32
    %43 = vector.broadcast %cst_8 : f32 to vector<1x384xf32>
    %44 = arith.addf %43, %38 : vector<1x384xf32>
    %45 = tpu.reciprocal %44 : vector<1x384xf32> -> vector<1x384xf32>
    %46 = arith.mulf %42, %45 : vector<1x384xf32>
    %47 = vector.broadcast %46 : vector<1x384xf32> to vector<8x384xf32>
    %48 = arith.mulf %35, %47 : vector<8x384xf32>
    %c0_9 = arith.constant 0 : index
    %c0_10 = arith.constant 0 : index
    %c0_11 = arith.constant 0 : index
    %49 = vector.load %arg4[%c0_9, %c0_10, %c0_11] : memref<1x16x384xf32, #tpu.memory_space<vmem>>, vector<1x8x384xf32>
    %50 = vector.shape_cast %49 : vector<1x8x384xf32> to vector<8x384xf32>
    %51 = vector.shape_cast %48 : vector<8x384xf32> to vector<1x8x384xf32>
    tpu.vector_store %arg4[%c0_9, %c0_10, %c0_11], %51 {strides = array<i32>} : memref<1x16x384xf32, #tpu.memory_space<vmem>>, vector<1x8x384xf32>,
    %52 = vector.extract_strided_slice %34 {offsets = [8, 0], sizes = [8, 384], strides = [1, 1]} : vector<16x384xf32> to vector<8x384xf32>
    %53 = arith.mulf %52, %52 : vector<8x384xf32>
    %cst_12 = arith.constant dense<0.000000e+00> : vector<384xf32>
    %54 = vector.multi_reduction <add>, %53, %cst_12 [0] : vector<8x384xf32> to vector<384xf32>
    %55 = vector.shape_cast %54 : vector<384xf32> to vector<1x384xf32>
    %cst_13 = arith.constant 9.99999971E-10 : f32
    %56 = vector.broadcast %cst_13 : f32 to vector<1x384xf32>
    %57 = arith.addf %55, %56 : vector<1x384xf32>
    %58 = math.rsqrt %57 : vector<1x384xf32>
    %59 = arith.mulf %55, %58 : vector<1x384xf32>
    %cst_14 = arith.constant 1.000000e+00 : f32
    %60 = vector.broadcast %cst_14 : f32 to vector<1x384xf32>
    %61 = arith.addf %60, %55 : vector<1x384xf32>
    %62 = tpu.reciprocal %61 : vector<1x384xf32> -> vector<1x384xf32>
    %63 = arith.mulf %59, %62 : vector<1x384xf32>
    %64 = vector.broadcast %63 : vector<1x384xf32> to vector<8x384xf32>
    %65 = arith.mulf %52, %64 : vector<8x384xf32>
    %c0_15 = arith.constant 0 : index
    %c8 = arith.constant 8 : index
    %c0_16 = arith.constant 0 : index
    %66 = vector.load %arg4[%c0_15, %c8, %c0_16] : memref<1x16x384xf32, #tpu.memory_space<vmem>>, vector<1x8x384xf32>
    %67 = vector.shape_cast %66 : vector<1x8x384xf32> to vector<8x384xf32>
    %68 = vector.shape_cast %65 : vector<8x384xf32> to vector<1x8x384xf32>
    tpu.vector_store %arg4[%c0_15, %c8, %c0_16], %68 {strides = array<i32>} : memref<1x16x384xf32, #tpu.memory_space<vmem>>, vector<1x8x384xf32>,
    return
  }
  func.func @transform_0(%arg0: i32) -> (i32, i32, i32) {
    %c0_i32 = arith.constant 0 : i32
    %c0_i32_0 = arith.constant 0 : i32
    %c0_i32_1 = arith.constant 0 : i32
    return %arg0, %c0_i32, %c0_i32_0 : i32, i32, i32
  }
  func.func @transform_1(%arg0: i32) -> (i32, i32) {
    %c0_i32 = arith.constant 0 : i32
    %c0_i32_0 = arith.constant 0 : i32
    %c0_i32_1 = arith.constant 0 : i32
    return %c0_i32, %c0_i32_0 : i32, i32
  }
  func.func @transform_2(%arg0: i32) -> (i32, i32) {
    %c0_i32 = arith.constant 0 : i32
    %c0_i32_0 = arith.constant 0 : i32
    %c0_i32_1 = arith.constant 0 : i32
    return %c0_i32, %c0_i32_0 : i32, i32
  }
  func.func @transform_3(%arg0: i32) -> (i32, i32, i32) {
    %c0_i32 = arith.constant 0 : i32
    %c0_i32_0 = arith.constant 0 : i32
    %c0_i32_1 = arith.constant 0 : i32
    return %arg0, %c0_i32, %c0_i32_0 : i32, i32, i32
  }
}

</mosaic_0001>

<bundles_post_ra>
// kernel: tpu_custom_call.1
= control target key start
LH: loop header
LB: loop body
LE: loop exit
PB: predicated region body
PF: predicated region fallthrough
CT: control target
= control target key end

     0   :  { %8 = vsyncpa [#allocation3], 0  ;;  %s1723_s0 = inlined_call_operand.hbm [shape: f32[2,8,512], index: 0, kind: input, shape index: {}]   ;;  %s1724_s1 = inlined_call_operand.hbm [shape: f32[16,200], index: 1, kind: input, shape index: {}]   ;;  %s1725_s2 = inlined_call_operand.vmem [shape: f32[1,384], index: 2, kind: input, shape index: {}]   ;;  %s1726_s3 = inlined_call_operand.hbm [shape: f32[2,16,384], index: 3, kind: output, shape index: {}]  }
   0x1   :  { %10 = vsyncpa [#allocation3 + $0x1], 0 }
   0x2   :  { %11 = vsyncpa [#allocation6], 0 }
   0x3   :  { %12 = vsyncpa [#allocation4], 0 }
   0x4   :  { %14 = vsyncpa [#allocation4 + $0x1], 0  ;;  %s1239_s12 = smov 0   ;;  %s1241_s13 = smov 0  }
   0x5   :  { %s1243_s14 = smov 0   ;;  %s1245_s15 = smov 0  }
   0x6 LB: > { %s1260_s16 = sadd.s32 4294967295, %s1192_s15   ;;  %s947_s17 = sadd.s32 4294967294, %s1192_s15   ;;  %s1192_s15 = sphi %s1245_s15, %s1748_s15   ;;  %s1188_s14 = sphi %s1243_s14, %s1747_s14   ;;  %s1184_s13 = sphi %s1241_s13, %s1746_s13   ;;  %s1180_s12 = sphi %s1239_s12, %s1745_s12  }
   0x7   : > { %p40_p0 = scmp.ne.s32.totalorder %s1184_s13, %s1180_s12  ;;  %p1727_p1 = scmp.eq.s32.totalorder %s1260_s16, 0 }
   0x8   : > { %p112_p3 = scmp.eq.s32.totalorder %s947_s17, 1  ;;  %p948_p5 = scmp.ge.s32.totalorder %s1192_s15, 1 }
   0x9   : > { %p1269_p4 = por %p1727_p1, %p40_p0  ;;  %p119_p7 = scmp.lt.s32.totalorder %s1192_s15, 3 }
   0xa   : > { %p1274_p6 = por %p112_p3, %p40_p0  ;;  %s1194_s21 = smov [#allocation5]  }
   0xb   : > { %s1731_s18 = scalar_select %p1269_p4, 1, 0 }
   0xc   : > { %s1732_s19 = scalar_select %p1274_p6, 1, 0 }
   0xd   : > { %p1279_p8 = pnand %p948_p5, %p119_p7  ;;  %s131_s22 = sshll.u32 %s1194_s21, 4  ;;  %s132_s22 = int_to_ptr.vmem [resolvable:$true] %s131_s22 }
   0xe   : > { %s1293_s24 = sadd.s32 1, %s1192_s15   ;;  %s27_s25 = sadd.s32 1, %s1188_s14 }
   0xf   : > { %s1733_s20 = scalar_select %p1279_p8, 1, 0 }
  0x10   : > { %p975_p9 = pneg %p1279_p8  ;;  %s24_s26 = ssub.s32 %s1192_s15, %s1293_s24 }
  0x11   : > { %s1081_s27 = scalar_lea.vmem %s132_s22, 512  ;;  %p1089_p5 = scmp.lt.s32.totalorder %s132_s22, %s132_s22 }
  0x12   : > { %p1288_p11 = pnand %p975_p9, %p1727_p1  ;;  %p1082_p13 = scmp.ne.s32.totalorder %s132_s22, %s1081_s27 }
  0x13   : > { %p1090_p7 = scmp.lt.s32.totalorder %s1081_s27, %s1081_s27 }
  0x14   : > { %p1072_p12 = pneg %p1288_p11 }
  0x15   : > { %p1091_p10 = por %p1090_p7, %p1089_p5 }
  0x16   : > { %p1084_p0 = pnand %p1082_p13, %p1072_p12 }
  0x18   : > { %p1085_p3 = pneg %p1084_p0 }
  0x1a   : > { %p1092_p2 = pnand %p1091_p10, %p1085_p3 }
  0x1c   : > { %1095 = shalt.err (!%p1092_p2)
}
  0x1d   : > { %s1195_s28 = smov 256   ;;  %s1196_s29 = smov 16  }
  0x1e   : > { %978 = dma.hbm_to_vmem [thread:$0]  (!%p1288_p11), %s1724_s1, 512, %s132_s22, [#allocation6], %s1195_s28, %s1195_s28, %s1196_s29  }
  0x1f   : > { %p25_p9 = scmp.eq.s32.totalorder %s24_s26, 0  ;;  %p34_p12 = scmp.ne.s32.totalorder %s1188_s14, %s1184_s13 }
  0x20   : > { %p35_p10 = scmp.eq.s32.totalorder %s1192_s15, 0  ;;  %p988_p2 = scmp.lt.s32.totalorder %s1192_s15, 2 }
  0x21   : > { %s1310_s5 = scalar_select %p25_p9, %s1188_s14, %s27_s25  }
  0x22   : > { %p36_p13 = por %p35_p10, %p34_p12  ;;  %p1735_p0 = scmp.eq.s32.totalorder %s1260_s16, 1 }
  0x23   : > { %s148_s7 = sand.u32 1, %s1188_s14   ;;  %s964_s8 = sshll.u32 %s1192_s15, 9 }
  0x24   : > { %p1314_p3 = por %p1735_p0, %p34_p12  ;;  %s951_s9 = sshll.u32 %s148_s7, 5 }
  0x25   : > { %s1323_s17 = scalar_lea.hbm %s1723_s0, %s964_s8  ;;  %s152_s21 = scalar_lea.vmem [#allocation2], %s951_s9 }
  0x26   : > { %s1736_s6 = scalar_select %p1314_p3, 1, 0 }
  0x27   : > { %s160_s22 = sshll.u32 %s152_s21, 4  ;;  %p1325_p11 = pnand %p988_p2, %p36_p13  ;;  %s161_s22 = int_to_ptr.vmem [resolvable:$true] %s160_s22 }
  0x28   : > { %s149_s25 = scalar_lea.sflag [#allocation3], %s148_s7  ;;  %s1096_s26 = scalar_lea.hbm %s1323_s17, 512 }
  0x29   : > { %p1097_p5 = scmp.ne.s32.totalorder %s1323_s17, %s1096_s26  ;;  %p1098_p7 = pneg %p1325_p11 }
  0x2a   : > { %s1101_s29 = scalar_lea.hbm %s1723_s0, 1024  ;;  %p1102_p10 = scmp.lt.s32.totalorder %s1323_s17, %s1723_s0 }
  0x2b   : > { %p1099_p9 = pnand %p1098_p7, %p1097_p5  ;;  %p1103_p2 = scmp.lt.s32.totalorder %s1101_s29, %s1096_s26 }
  0x2d   : > { %p1100_p12 = pneg %p1099_p9  ;;  %p1104_p13 = por %p1103_p2, %p1102_p10 }
  0x2f   : > { %p1105_p0 = pnand %p1104_p13, %p1100_p12 }
  0x31   : > { %1108 = shalt.err (!%p1105_p0)
}
  0x32   : > { %s1109_s8 = scalar_lea.vmem %s161_s22, 512  ;;  %s1197_s7 = smov [#allocation2]  }
  0x33   : > { %p1110_p1 = scmp.ne.s32.totalorder %s161_s22, %s1109_s8  ;;  %s1114_s9 = sshll.u32 %s1197_s7, 4  ;;  %s1115_s9 = int_to_ptr.vmem [resolvable:$false] %s1114_s9 }
  0x34   : > { %s1116_s10 = scalar_lea.vmem %s1115_s9, 1024  ;;  %p1117_p5 = scmp.lt.s32.totalorder %s161_s22, %s1115_s9 }
  0x35   : > { %p1112_p6 = pnand %p1110_p1, %p1098_p7  ;;  %p1118_p9 = scmp.lt.s32.totalorder %s1116_s10, %s1109_s8 }
  0x37   : > { %p1113_p3 = pneg %p1112_p6  ;;  %p1119_p4 = por %p1118_p9, %p1117_p5 }
  0x39   : > { %p1120_p8 = pnand %p1119_p4, %p1113_p3 }
  0x3b   : > { %1123 = shalt.err (!%p1120_p8)
}
  0x3c   : > { %982 = dma.hbm_to_vmem [thread:$0]  (!%p1325_p11), %s1323_s17, 512, %s161_s22, %s149_s25  }
  0x3d   : > { %p1738_p12 = scmp.ne.s32.totalorder %s1733_s20, 0 }
  0x3e   : > { %s1346_s11 = sand.u32 (!%p1738_p12), 1, %s1184_s13   ;;  %p1739_p1 = scmp.ne.s32.totalorder (!%p1738_p12), %s1731_s18, 0 }
  0x3f   : > { %169 = sbr.rel (%p1738_p12) target bundleno = 638 (0x27e), region = 32  ;;  %s955_s21 = sshll.u32 (!%p1738_p12), %s1346_s11, 5 }
  0x40   : > { %s172_s26 = scalar_lea.sflag (!%p1738_p12), [#allocation3], %s1346_s11  ;;  %s175_s27 = scalar_lea.vmem (!%p1738_p12), [#allocation2], %s955_s21 }
  0x44   : > { %1167 = dma.done.wait (%p1739_p1), %s172_s26, 512  }
  0x45   : > { %1169 = vsyncadd (%p1739_p1), %s172_s26, 4294966784  ;;  %p1740_p4 = scmp.eq.s32.totalorder %s1260_s16, 0 }
  0x47   : > { %1171 = dma.done.wait (%p1740_p4), [#allocation6], 512   ;;  %p1741_p6 = pmov %p1740_p4 }
  0x48   : > { %v1358_v0 = vld [vmem:[%s175_s27 + $0x18] sm:$0xff]  ;;  %v1360_v1 = vld [vmem:[%s175_s27 + $0x8] sm:$0xff]  ;;  %s1198_s20 = smov 105   ;;  %v1364_v2 = vld [vmem:[%s175_s27 + $0x10] sm:$0xff]  ;;  %s1199_s18 = smov 106   ;;  %v1206_v4 = vmov 0.0  }
  0x49   : > { %1173 = vsyncadd (%p1741_p6), [#allocation6], 4294966784  ;;  %321 = vrot.lane.b32.xlu1 %v1358_v0, %s1198_s20  ;;  %317 = vrot.lane.b32.xlu0 %v1360_v1, %s1198_s20  ;;  %v1366_v3 = vld [vmem:[%s175_s27] sm:$0xff]  ;;  %s1200_s17 = smov 107   ;;  %s1201_s22 = smov 108   ;;  %vm323_vm0 = vcmask 859136  }
  0x4a   : > { %s1202_s23 = smov 109   ;;  %s1203_s25 = smov 125   ;;  %662 = vmatprep.subr.mxu1 %v1206_v4  ;;  %vm308_vm1 = vcmask 867328   ;;  %vm293_vm2 = vcmask 875520   ;;  %vm278_vm3 = vcmask 883712   ;;  %vm443_vm4 = vcmask 891904  }
  0x4b   : > { %s1204_s28 = smov 126   ;;  %s1205_s29 = smov 127   ;;  %vm248_vm5 = vcmask 1022976   ;;  %vm233_vm6 = vcmask 1031168   ;;  %vm218_vm7 = vcmask 1039360   ;;  %vm428_vm8 = vcmask 556032  }
  0x4c   : > { %s1207_s30 = smov 68   ;;  %s1208_s4 = smov 84   ;;  %v575_v62 = vld [vmem:[#allocation5 + $0x8] sm:$0xff]  ;;  %vm578_vm9 = vcmask 588800   ;;  %vm413_vm10 = vcmask 687104   ;;  %vm398_vm11 = vcmask 695296  }
  0x4d   : > { %319 = vrot.lane.b32.xlu0 %v1364_v2, %s1198_s20  ;;  %315 = vrot.lane.b32.xlu1 %v1366_v3, %s1198_s20  ;;  %s1209_s8 = smov 85   ;;  %s1210_s7 = smov 86   ;;  %vm383_vm12 = vcmask 703488   ;;  %vm368_vm13 = vcmask 711680   ;;  %vm353_vm14 = vcmask 719872   ;;  %vm338_vm15 = vcmask 850944  }
  0x4e   : > { %s1211_s9 = smov 87   ;;  %s1212_s10 = smov 88   ;;  %957 = vmatprep.mubr.msk.f32.mxu0 %vm578_vm9, %v575_v62  ;;  %959 = vmatprep.mubr.msk.f32.mxu1 %vm578_vm9, %v575_v62 }
  0x4f   : > { %s1213_s21 = smov 104   ;;  %s1214_s26 = smov 124  }
  0x50   : > { %s1215_s27 = smov 67   ;;  %p1742_p3 = scmp.ne.s32.totalorder %s1736_s6, 0 }
  0x51   : > { %302 = vrot.lane.b32.xlu0 %v1360_v1, %s1199_s18  ;;  %304 = vrot.lane.b32.xlu1 %v1364_v2, %s1199_s18 }
  0x55   : > { %306 = vrot.lane.b32.xlu0 %v1358_v0, %s1199_s18  ;;  %300 = vrot.lane.b32.xlu1 %v1366_v3, %s1199_s18 }
  0x59   : > { %287 = vrot.lane.b32.xlu0 %v1360_v1, %s1200_s17  ;;  %289 = vrot.lane.b32.xlu1 %v1364_v2, %s1200_s17 }
  0x5d   : > { %291 = vrot.lane.b32.xlu0 %v1358_v0, %s1200_s17  ;;  %285 = vrot.lane.b32.xlu1 %v1366_v3, %s1200_s17  ;;  %s965_s17 = smul.u32 48, %s1346_s11 }
  0x61   : > { %272 = vrot.lane.b32.xlu0 %v1360_v1, %s1201_s22  ;;  %274 = vrot.lane.b32.xlu1 %v1364_v2, %s1201_s22 }
  0x65   : > { %276 = vrot.lane.b32.xlu0 %v1358_v0, %s1201_s22  ;;  %270 = vrot.lane.b32.xlu1 %v1366_v3, %s1201_s22  ;;  %s201_s22 = scalar_lea.vmem [#allocation7], %s965_s17 }
  0x69   : > { %437 = vrot.lane.b32.xlu0 %v1360_v1, %s1202_s23  ;;  %439 = vrot.lane.b32.xlu1 %v1364_v2, %s1202_s23 }
  0x6d   : > { %441 = vrot.lane.b32.xlu0 %v1358_v0, %s1202_s23  ;;  %435 = vrot.lane.b32.xlu1 %v1366_v3, %s1202_s23  ;;  %s864_s23 = sshll.u32 %s201_s22, 4  ;;  %s1673_s23 = int_to_ptr.vmem [resolvable:$true] %s864_s23 }
  0x71   : > { %242 = vrot.lane.b32.xlu0 %v1360_v1, %s1203_s25  ;;  %244 = vrot.lane.b32.xlu1 %v1364_v2, %s1203_s25 }
  0x75   : > { %246 = vrot.lane.b32.xlu0 %v1358_v0, %s1203_s25  ;;  %240 = vrot.lane.b32.xlu1 %v1366_v3, %s1203_s25  ;;  %s966_s25 = smul.u32 768, %s1260_s16  ;;  %s851_s16 = scalar_lea.sflag [#allocation4], %s1346_s11 }
  0x79   : > { %227 = vrot.lane.b32.xlu0 %v1360_v1, %s1204_s28  ;;  %229 = vrot.lane.b32.xlu1 %v1364_v2, %s1204_s28 }
  0x7d   : > { %231 = vrot.lane.b32.xlu0 %v1358_v0, %s1204_s28  ;;  %225 = vrot.lane.b32.xlu1 %v1366_v3, %s1204_s28 }
  0x81   : > { %212 = vrot.lane.b32.xlu0 %v1360_v1, %s1205_s29  ;;  %214 = vrot.lane.b32.xlu1 %v1364_v2, %s1205_s29 }
  0x85   : > { %216 = vrot.lane.b32.xlu0 %v1358_v0, %s1205_s29  ;;  %210 = vrot.lane.b32.xlu1 %v1366_v3, %s1205_s29 }
  0x89   : > { %422 = vrot.lane.b32.xlu0 %v1360_v1, %s1207_s30  ;;  %424 = vrot.lane.b32.xlu1 %v1364_v2, %s1207_s30 }
  0x8d   : > { %420 = vrot.lane.b32.xlu0 %v1366_v3, %s1207_s30  ;;  %407 = vrot.lane.b32.xlu1 %v1360_v1, %s1208_s4 }
  0x91   : > { %409 = vrot.lane.b32.xlu0 %v1364_v2, %s1208_s4  ;;  %405 = vrot.lane.b32.xlu1 %v1366_v3, %s1208_s4 }
  0x95   : > { %426 = vrot.lane.b32.xlu0 %v1358_v0, %s1207_s30  ;;  %392 = vrot.lane.b32.xlu1 %v1360_v1, %s1209_s8  ;;  %s1680_s30 = scalar_lea.hbm %s1726_s3, %s966_s25 }
  0x99   : > { %394 = vrot.lane.b32.xlu0 %v1364_v2, %s1209_s8  ;;  %390 = vrot.lane.b32.xlu1 %v1366_v3, %s1209_s8 }
  0x9d   : > { %411 = vrot.lane.b32.xlu0 %v1358_v0, %s1208_s4  ;;  %377 = vrot.lane.b32.xlu1 %v1360_v1, %s1210_s7  ;;  %s1124_s4 = scalar_lea.vmem %s1673_s23, 768 }
  0x9e   : > { %p1125_p8 = scmp.ne.s32.totalorder %s1673_s23, %s1124_s4 }
  0xa0   : > { %p1126_p11 = pnand %p1125_p8, %p1742_p3 }
  0xa1   : > { %379 = vrot.lane.b32.xlu0 %v1364_v2, %s1210_s7  ;;  %375 = vrot.lane.b32.xlu1 %v1366_v3, %s1210_s7 }
  0xa2   : > { %p1127_p7 = pneg %p1126_p11 }
  0xa5   : > { %396 = vrot.lane.b32.xlu0 %v1358_v0, %s1209_s8  ;;  %362 = vrot.lane.b32.xlu1 %v1360_v1, %s1211_s9  ;;  %s1216_s8 = smov [#allocation7]  }
  0xa9   : > { %364 = vrot.lane.b32.xlu0 %v1364_v2, %s1211_s9  ;;  %360 = vrot.lane.b32.xlu1 %v1366_v3, %s1211_s9 }
  0xad   : > { %381 = vrot.lane.b32.xlu0 %v1358_v0, %s1210_s7  ;;  %347 = vrot.lane.b32.xlu1 %v1360_v1, %s1212_s10  ;;  %s1128_s7 = sshll.u32 %s1216_s8, 4  ;;  %s1129_s7 = int_to_ptr.vmem [resolvable:$false] %s1128_s7 }
  0xae   : > { %p1131_p10 = scmp.lt.s32.totalorder %s1673_s23, %s1129_s7 }
  0xb1   : > { %349 = vrot.lane.b32.xlu0 %v1364_v2, %s1212_s10  ;;  %345 = vrot.lane.b32.xlu1 %v1366_v3, %s1212_s10 }
  0xb5   : > { %366 = vrot.lane.b32.xlu0 %v1358_v0, %s1211_s9  ;;  %332 = vrot.lane.b32.xlu1 %v1360_v1, %s1213_s21  ;;  %s1130_s9 = scalar_lea.vmem %s1129_s7, 1536 }
  0xb6   : > { %p1132_p2 = scmp.lt.s32.totalorder %s1130_s9, %s1124_s4 }
  0xb8   : > { %p1133_p13 = por %p1132_p2, %p1131_p10 }
  0xb9   : > { %334 = vrot.lane.b32.xlu0 %v1364_v2, %s1213_s21  ;;  %330 = vrot.lane.b32.xlu1 %v1366_v3, %s1213_s21 }
  0xba   : > { %p1134_p0 = pnand %p1133_p13, %p1127_p7 }
  0xbb   : > { %v322_v5 = vpop.permute.xlu1 %321  ;;  %v318_v6 = vpop.permute.xlu0 %317 }
  0xbd   : > { %351 = vrot.lane.b32.xlu0 %v1358_v0, %s1212_s10  ;;  %336 = vrot.lane.b32.xlu1 %v1358_v0, %s1213_s21 }
  0xbf   : > { %v320_v7 = vpop.permute.xlu0 %319  ;;  %v316_v8 = vpop.permute.xlu1 %315 }
  0xc0   : > { %v1431_v13 = vsel %vm323_vm0, %v318_v6, %v320_v7  ;;  %v1433_v14 = vsel %vm323_vm0, %v320_v7, %v322_v5  ;;  %v1439_v17 = vsel %vm323_vm0, %v316_v8, %v318_v6  ;;  %vm263_vm0 = vcmask 1014784  }
  0xc1   : > { %257 = vrot.lane.b32.xlu0 %v1360_v1, %s1214_s26  ;;  %259 = vrot.lane.b32.xlu1 %v1364_v2, %s1214_s26 }
  0xc3   : > { %v303_v9 = vpop.permute.xlu0 %302  ;;  %v305_v10 = vpop.permute.xlu1 %304 }
  0xc4   : > { %v1441_v18 = vsel %vm308_vm1, %v303_v9, %v305_v10 }
  0xc5   : > { %255 = vrot.lane.b32.xlu0 %v1366_v3, %s1214_s26  ;;  %261 = vrot.lane.b32.xlu1 %v1358_v0, %s1214_s26 }
  0xc7   : > { %v307_v11 = vpop.permute.xlu0 %306  ;;  %v301_v12 = vpop.permute.xlu1 %300 }
  0xc8   : > { %v1447_v21 = vsel %vm308_vm1, %v305_v10, %v307_v11  ;;  %v1449_v22 = vsel %vm308_vm1, %v301_v12, %v303_v9  ;;  %vm519_vm1 = vcmask 547840  }
  0xc9   : > { %513 = vrot.lane.b32.xlu0 %v1431_v13, %s1215_s27  ;;  %515 = vrot.lane.b32.xlu1 %v1433_v14, %s1215_s27 }
  0xcb   : > { %v288_v15 = vpop.permute.xlu0 %287  ;;  %v290_v16 = vpop.permute.xlu1 %289 }
  0xcc   : > { %v1455_v25 = vsel %vm293_vm2, %v288_v15, %v290_v16 }
  0xcd   : > { %511 = vrot.lane.b32.xlu0 %v1439_v17, %s1215_s27  ;;  %505 = vrot.lane.b32.xlu1 %v1441_v18, %s1215_s27 }
  0xcf   : > { %v292_v19 = vpop.permute.xlu0 %291  ;;  %v286_v20 = vpop.permute.xlu1 %285 }
  0xd0   : > { %v1460_v28 = vsel %vm293_vm2, %v290_v16, %v292_v19  ;;  %v1462_v29 = vsel %vm293_vm2, %v286_v20, %v288_v15 }
  0xd1   : > { %507 = vrot.lane.b32.xlu0 %v1447_v21, %s1215_s27  ;;  %503 = vrot.lane.b32.xlu1 %v1449_v22, %s1215_s27 }
  0xd3   : > { %v273_v23 = vpop.permute.xlu0 %272  ;;  %v275_v24 = vpop.permute.xlu1 %274 }
  0xd4   : > { %v1468_v32 = vsel %vm278_vm3, %v273_v23, %v275_v24 }
  0xd5   : > { %517 = vrot.lane.b32.xlu0 %v322_v5, %s1215_s27  ;;  %497 = vrot.lane.b32.xlu1 %v1455_v25, %s1215_s27 }
  0xd7   : > { %v277_v26 = vpop.permute.xlu0 %276  ;;  %v271_v27 = vpop.permute.xlu1 %270 }
  0xd8   : > { %v1473_v35 = vsel %vm278_vm3, %v275_v24, %v277_v26  ;;  %v1475_v36 = vsel %vm278_vm3, %v271_v27, %v273_v23 }
  0xd9   : > { %499 = vrot.lane.b32.xlu0 %v1460_v28, %s1215_s27  ;;  %495 = vrot.lane.b32.xlu1 %v1462_v29, %s1215_s27 }
  0xdb   : > { %v438_v30 = vpop.permute.xlu0 %437  ;;  %v440_v31 = vpop.permute.xlu1 %439 }
  0xdc   : > { %v445_v39 = vsel %vm443_vm4, %v438_v30, %v440_v31 }
  0xdd   : > { %509 = vrot.lane.b32.xlu0 %v307_v11, %s1215_s27  ;;  %489 = vrot.lane.b32.xlu1 %v1468_v32, %s1215_s27 }
  0xdf   : > { %v442_v33 = vpop.permute.xlu0 %441  ;;  %v436_v34 = vpop.permute.xlu1 %435 }
  0xe0   : > { %v446_v42 = vsel %vm443_vm4, %v440_v31, %v442_v33  ;;  %v444_v43 = vsel %vm443_vm4, %v436_v34, %v438_v30 }
  0xe1   : > { %491 = vrot.lane.b32.xlu0 %v1473_v35, %s1215_s27  ;;  %487 = vrot.lane.b32.xlu1 %v1475_v36, %s1215_s27 }
  0xe3   : > { %v243_v37 = vpop.permute.xlu0 %242  ;;  %v245_v38 = vpop.permute.xlu1 %244 }
  0xe4   : > { %v1485_v46 = vsel %vm248_vm5, %v243_v37, %v245_v38 }
  0xe5   : > { %501 = vrot.lane.b32.xlu0 %v292_v19, %s1215_s27  ;;  %481 = vrot.lane.b32.xlu1 %v445_v39, %s1215_s27 }
  0xe7   : > { %v247_v40 = vpop.permute.xlu0 %246  ;;  %v241_v41 = vpop.permute.xlu1 %240 }
  0xe8   : > { %v1490_v49 = vsel %vm248_vm5, %v245_v38, %v247_v40  ;;  %v1492_v50 = vsel %vm248_vm5, %v241_v41, %v243_v37 }
  0xe9   : > { %483 = vrot.lane.b32.xlu0 %v446_v42, %s1215_s27  ;;  %479 = vrot.lane.b32.xlu1 %v444_v43, %s1215_s27 }
  0xeb   : > { %v228_v44 = vpop.permute.xlu0 %227  ;;  %v230_v45 = vpop.permute.xlu1 %229 }
  0xec   : > { %v1498_v53 = vsel %vm233_vm6, %v228_v44, %v230_v45 }
  0xed   : > { %493 = vrot.lane.b32.xlu0 %v277_v26, %s1215_s27  ;;  %473 = vrot.lane.b32.xlu1 %v1485_v46, %s1215_s27 }
  0xef   : > { %v232_v47 = vpop.permute.xlu0 %231  ;;  %v226_v48 = vpop.permute.xlu1 %225 }
  0xf0   : > { %v1503_v56 = vsel %vm233_vm6, %v230_v45, %v232_v47  ;;  %v1505_v57 = vsel %vm233_vm6, %v226_v48, %v228_v44 }
  0xf1   : > { %475 = vrot.lane.b32.xlu0 %v1490_v49, %s1215_s27  ;;  %471 = vrot.lane.b32.xlu1 %v1492_v50, %s1215_s27 }
  0xf3   : > { %v213_v51 = vpop.permute.xlu0 %212  ;;  %v215_v52 = vpop.permute.xlu1 %214 }
  0xf4   : > { %v1512_v60 = vsel %vm218_vm7, %v213_v51, %v215_v52 }
  0xf5   : > { %485 = vrot.lane.b32.xlu0 %v442_v33, %s1215_s27  ;;  %465 = vrot.lane.b32.xlu1 %v1498_v53, %s1215_s27 }
  0xf7   : > { %v217_v54 = vpop.permute.xlu0 %216  ;;  %v211_v55 = vpop.permute.xlu1 %210 }
  0xf8   : > { %v1521_v6 = vsel %vm218_vm7, %v215_v52, %v217_v54  ;;  %v1524_v7 = vsel %vm218_vm7, %v211_v55, %v213_v51 }
  0xf9   : > { %467 = vrot.lane.b32.xlu0 %v1503_v56, %s1215_s27  ;;  %463 = vrot.lane.b32.xlu1 %v1505_v57, %s1215_s27 }
  0xfb   : > { %v423_v58 = vpop.permute.xlu0 %422  ;;  %v425_v59 = vpop.permute.xlu1 %424 }
  0xfc   : > { %v430_v61 = vsel %vm428_vm8, %v423_v58, %v425_v59 }
  0xfd   : > { %477 = vrot.lane.b32.xlu0 %v247_v40, %s1215_s27  ;;  %457 = vrot.lane.b32.xlu1 %v1512_v60, %s1215_s27 }
  0xfe   : > { %585 = vmatprep.subr.mxu0 %v430_v61 }
  0xff   : > { %v421_v63 = vpop.permute.xlu0 %420  ;;  %v408_v5 = vpop.permute.xlu1 %407 }
 0x100   : > { %v429_v8 = vsel %vm428_vm8, %v421_v63, %v423_v58 }
 0x101   : > { %459 = vrot.lane.b32.xlu0 %v1521_v6, %s1215_s27  ;;  %455 = vrot.lane.b32.xlu1 %v1524_v7, %s1215_s27 }
 0x102   : > { %586 = vmatpush1.msra.mxu0 %v429_v8 }
 0x103   : > { %v410_v9 = vpop.permute.xlu0 %409  ;;  %v406_v10 = vpop.permute.xlu1 %405 }
 0x104   : > { %v415_v11 = vsel %vm413_vm10, %v408_v5, %v410_v9  ;;  %v414_v12 = vsel %vm413_vm10, %v406_v10, %v408_v5 }
 0x105   : > { %469 = vrot.lane.b32.xlu0 %v232_v47, %s1215_s27  ;;  %449 = vrot.lane.b32.xlu1 %v1360_v1, %s1215_s27 }
 0x106   : > { %587 = vmatprep.subr.mxu0 %v415_v11 }
 0x107   : > { %588 = vmatpush1.msra.mxu0 %v414_v12  ;;  %v427_v15 = vpop.permute.xlu0 %426  ;;  %v393_v16 = vpop.permute.xlu1 %392 }
 0x108   : > { %v431_v19 = vsel %vm428_vm8, %v425_v59, %v427_v15 }
 0x109   : > { %451 = vrot.lane.b32.xlu0 %v1364_v2, %s1215_s27  ;;  %447 = vrot.lane.b32.xlu1 %v1366_v3, %s1215_s27 }
 0x10a   : > { %663 = vmatpush1.msra.mxu1 %v431_v19 }
 0x10b   : > { %v395_v20 = vpop.permute.xlu0 %394  ;;  %v391_v23 = vpop.permute.xlu1 %390  ;;  %664 = vmatprep.subr.mxu1 %v1206_v4 }
 0x10c   : > { %v400_v24 = vsel %vm398_vm11, %v393_v16, %v395_v20  ;;  %v399_v26 = vsel %vm398_vm11, %v391_v23, %v393_v16 }
 0x10d   : > { %461 = vrot.lane.b32.xlu0 %v217_v54, %s1215_s27  ;;  %453 = vrot.lane.b32.xlu1 %v1358_v0, %s1215_s27 }
 0x10e   : > { %589 = vmatprep.subr.mxu0 %v400_v24 }
 0x10f   : > { %590 = vmatpush1.msra.mxu0 %v399_v26  ;;  %v412_v27 = vpop.permute.xlu0 %411  ;;  %v378_v30 = vpop.permute.xlu1 %377 }
 0x110   : > { %v416_v31 = vsel %vm413_vm10, %v410_v9, %v412_v27 }
 0x111   : > { %665 = vmatpush1.msra.mxu1 %v416_v31 }
 0x112   : > { %666 = vmatprep.subr.mxu1 %v1206_v4 }
 0x113   : > { %v380_v33 = vpop.permute.xlu0 %379  ;;  %v376_v34 = vpop.permute.xlu1 %375 }
 0x114   : > { %v385_v37 = vsel %vm383_vm12, %v378_v30, %v380_v33  ;;  %v384_v38 = vsel %vm383_vm12, %v376_v34, %v378_v30 }
 0x115   : > { %591 = vmatprep.subr.mxu0 %v385_v37 }
 0x116   : > { %592 = vmatpush1.msra.mxu0 %v384_v38 }
 0x117   : > { %v397_v39 = vpop.permute.xlu0 %396  ;;  %v363_v0 = vpop.permute.xlu1 %362 }
 0x118   : > { %v401_v40 = vsel %vm398_vm11, %v395_v20, %v397_v39 }
 0x119   : > { %667 = vmatpush1.msra.mxu1 %v401_v40 }
 0x11a   : > { %668 = vmatprep.subr.mxu1 %v1206_v4 }
 0x11b   : > { %v365_v41 = vpop.permute.xlu0 %364  ;;  %v361_v42 = vpop.permute.xlu1 %360 }
 0x11c   : > { %v370_v43 = vsel %vm368_vm13, %v363_v0, %v365_v41  ;;  %v369_v44 = vsel %vm368_vm13, %v361_v42, %v363_v0 }
 0x11d   : > { %593 = vmatprep.subr.mxu0 %v370_v43 }
 0x11e   : > { %594 = vmatpush1.msra.mxu0 %v369_v44 }
 0x11f   : > { %v382_v45 = vpop.permute.xlu0 %381  ;;  %v348_v47 = vpop.permute.xlu1 %347 }
 0x120   : > { %v386_v48 = vsel %vm383_vm12, %v380_v33, %v382_v45 }
 0x121   : > { %669 = vmatpush1.msra.mxu1 %v386_v48 }
 0x122   : > { %670 = vmatprep.subr.mxu1 %v1206_v4 }
 0x123   : > { %v350_v51 = vpop.permute.xlu0 %349  ;;  %v346_v52 = vpop.permute.xlu1 %345 }
 0x124   : > { %v355_v54 = vsel %vm353_vm14, %v348_v47, %v350_v51  ;;  %v354_v55 = vsel %vm353_vm14, %v346_v52, %v348_v47 }
 0x125   : > { %595 = vmatprep.subr.mxu0 %v355_v54 }
 0x126   : > { %596 = vmatpush1.msra.mxu0 %v354_v55 }
 0x127   : > { %v367_v58 = vpop.permute.xlu0 %366  ;;  %v333_v59 = vpop.permute.xlu1 %332 }
 0x128   : > { %v371_v61 = vsel %vm368_vm13, %v365_v41, %v367_v58 }
 0x129   : > { %671 = vmatpush1.msra.mxu1 %v371_v61 }
 0x12a   : > { %672 = vmatprep.subr.mxu1 %v1206_v4 }
 0x12b   : > { %v335_v62 = vpop.permute.xlu0 %334  ;;  %v331_v63 = vpop.permute.xlu1 %330 }
 0x12c   : > { %v340_v5 = vsel %vm338_vm15, %v333_v59, %v335_v62  ;;  %v339_v8 = vsel %vm338_vm15, %v331_v63, %v333_v59 }
 0x12d   : > { %597 = vmatprep.subr.mxu0 %v340_v5 }
 0x12e   : > { %598 = vmatpush1.msra.mxu0 %v339_v8 }
 0x12f   : > { %v352_v9 = vpop.permute.xlu0 %351  ;;  %599 = vmatprep.subr.mxu0 %v1431_v13  ;;  %v337_v10 = vpop.permute.xlu1 %336 }
 0x130   : > { %600 = vmatpush1.msra.mxu0 %v1439_v17  ;;  %v356_v11 = vsel %vm353_vm14, %v350_v51, %v352_v9  ;;  %v341_v12 = vsel %vm338_vm15, %v335_v62, %v337_v10 }
 0x131   : > { %601 = vmatprep.subr.mxu0 %v1441_v18  ;;  %673 = vmatpush1.msra.mxu1 %v356_v11 }
 0x132   : > { %602 = vmatpush1.msra.mxu0 %v1449_v22  ;;  %674 = vmatprep.subr.mxu1 %v1206_v4 }
 0x133   : > { %v258_v15 = vpop.permute.xlu0 %257  ;;  %603 = vmatprep.subr.mxu0 %v1455_v25  ;;  %675 = vmatpush1.msra.mxu1 %v341_v12  ;;  %v260_v16 = vpop.permute.xlu1 %259 }
 0x134   : > { %604 = vmatpush1.msra.mxu0 %v1462_v29  ;;  %676 = vmatprep.subr.mxu1 %v1206_v4  ;;  %v265_v13 = vsel %vm263_vm0, %v258_v15, %v260_v16 }
 0x135   : > { %605 = vmatprep.subr.mxu0 %v1468_v32  ;;  %677 = vmatpush1.msra.mxu1 %v1433_v14 }
 0x136   : > { %606 = vmatpush1.msra.mxu0 %v1475_v36  ;;  %678 = vmatprep.subr.mxu1 %v1206_v4 }
 0x137   : > { %v256_v17 = vpop.permute.xlu0 %255  ;;  %607 = vmatprep.subr.mxu0 %v265_v13  ;;  %679 = vmatpush1.msra.mxu1 %v1447_v21  ;;  %v262_v18 = vpop.permute.xlu1 %261 }
 0x138   : > { %680 = vmatprep.subr.mxu1 %v1206_v4  ;;  %v264_v22 = vsel %vm263_vm0, %v256_v17, %v258_v15  ;;  %v266_v21 = vsel %vm263_vm0, %v260_v16, %v262_v18  ;;  %v574_v17 = vld [vmem:[#allocation5] sm:$0xff]  ;;  %v577_v18 = vld [vmem:[#allocation5 + $0x18] sm:$0xff] }
 0x139   : > { %608 = vmatpush1.msra.mxu0 %v264_v22  ;;  %681 = vmatpush1.msra.mxu1 %v1460_v28 }
 0x13a   : > { %609 = vmatprep.subr.mxu0 %v1485_v46  ;;  %682 = vmatprep.subr.mxu1 %v1206_v4 }
 0x13b   : > { %v514_v14 = vpop.permute.xlu0 %513  ;;  %610 = vmatpush1.msra.mxu0 %v1492_v50  ;;  %683 = vmatpush1.msra.mxu1 %v1473_v35  ;;  %v516_v25 = vpop.permute.xlu1 %515 }
 0x13c   : > { %611 = vmatprep.subr.mxu0 %v1498_v53  ;;  %684 = vmatprep.subr.mxu1 %v1206_v4  ;;  %v545_v32 = vsel %vm519_vm1, %v514_v14, %v516_v25 }
 0x13d   : > { %612 = vmatpush1.msra.mxu0 %v1505_v57  ;;  %685 = vmatpush1.msra.mxu1 %v266_v21  ;;  %v576_v21 = vld [vmem:[#allocation5 + $0x10] sm:$0xff] }
 0x13e   : > { %613 = vmatprep.subr.mxu0 %v1512_v60  ;;  %686 = vmatprep.subr.mxu1 %v1206_v4 }
 0x13f   : > { %v512_v28 = vpop.permute.xlu0 %511  ;;  %614 = vmatpush1.msra.mxu0 %v1524_v7  ;;  %687 = vmatpush1.msra.mxu1 %v1490_v49  ;;  %v506_v29 = vpop.permute.xlu1 %505 }
 0x140   : > { %615 = vmatprep.subr.mxu0 %v1360_v1  ;;  %688 = vmatprep.subr.mxu1 %v1206_v4  ;;  %v544_v35 = vsel %vm519_vm1, %v512_v28, %v514_v14 }
 0x141   : > { %616 = vmatpush1.msra.mxu0 %v1366_v3  ;;  %689 = vmatpush1.msra.mxu1 %v1503_v56 }
 0x142   : > { %631 = vmatprep.subr.mxu0 %v545_v32  ;;  %690 = vmatprep.subr.mxu1 %v1206_v4 }
 0x143   : > { %v508_v36 = vpop.permute.xlu0 %507  ;;  %632 = vmatpush2.msra.mxu0 %v544_v35  ;;  %691 = vmatpush1.msra.mxu1 %v1521_v6  ;;  %v504_v46 = vpop.permute.xlu1 %503 }
 0x144   : > { %v542_v1 = vsel %vm519_vm1, %v506_v29, %v508_v36  ;;  %v541_v49 = vsel %vm519_vm1, %v504_v46, %v506_v29  ;;  %692 = vmatprep.subr.mxu1 %v1206_v4  ;;  %v739_v29 = vlaneseq }
 0x145   : > { %633 = vmatprep.subr.mxu0 %v542_v1  ;;  %693 = vmatpush1.msra.mxu1 %v1364_v2 }
 0x146   : > { %634 = vmatpush2.msra.mxu0 %v541_v49  ;;  %708 = vmatprep.subr.mxu1 %v1206_v4  ;;  %v740_v32 = vshrl.u32 %v739_v29, 7 }
 0x147   : > { %v518_v3 = vpop.permute.xlu0 %517  ;;  %v498_v50 = vpop.permute.xlu1 %497 }
 0x148   : > { %v546_v53 = vsel %vm519_vm1, %v516_v25, %v518_v3  ;;  %v741_v35 = vsub.s32 0, %v740_v32  ;;  %v745_v46 = vsub.s32 1, %v740_v32  ;;  %v749_v49 = vsub.s32 2, %v740_v32 }
 0x149   : > { %709 = vmatpush2.msra.mxu1 %v546_v53 }
 0x14a   : > { %710 = vmatprep.subr.mxu1 %v1206_v4 }
 0x14b   : > { %v500_v56 = vpop.permute.xlu0 %499  ;;  %v496_v57 = vpop.permute.xlu1 %495 }
 0x14c   : > { %v539_v60 = vsel %vm519_vm1, %v498_v50, %v500_v56  ;;  %v538_v6 = vsel %vm519_vm1, %v496_v57, %v498_v50 }
 0x14d   : > { %635 = vmatprep.subr.mxu0 %v539_v60 }
 0x14e   : > { %636 = vmatpush2.msra.mxu0 %v538_v6 }
 0x14f   : > { %v510_v7 = vpop.permute.xlu0 %509  ;;  %v490_v2 = vpop.permute.xlu1 %489 }
 0x150   : > { %v543_v19 = vsel %vm519_vm1, %v508_v36, %v510_v7  ;;  %v737_v36 = vld [vmem:[%s1725_s2] sm:$0x7] }
 0x151   : > { %711 = vmatpush2.msra.mxu1 %v543_v19  ;;  %v742_v1 = vrot.slane %v737_v36, %v741_v35  ;;  %v746_v3 = vrot.slane %v737_v36, %v745_v46 }
 0x152   : > { %712 = vmatprep.subr.mxu1 %v1206_v4 }
 0x153   : > { %v492_v20 = vpop.permute.xlu0 %491  ;;  %v488_v23 = vpop.permute.xlu1 %487 }
 0x154   : > { %v536_v24 = vsel %vm519_vm1, %v490_v2, %v492_v20  ;;  %v535_v26 = vsel %vm519_vm1, %v488_v23, %v490_v2 }
 0x155   : > { %637 = vmatprep.subr.mxu0 %v536_v24 }
 0x156   : > { %638 = vmatpush2.msra.mxu0 %v535_v26 }
 0x157   : > { %v502_v27 = vpop.permute.xlu0 %501  ;;  %v482_v30 = vpop.permute.xlu1 %481 }
 0x158   : > { %v540_v31 = vsel %vm519_vm1, %v500_v56, %v502_v27  ;;  %v750_v56 = vrot.slane %v737_v36, %v749_v49 }
 0x159   : > { %713 = vmatpush2.msra.mxu1 %v540_v31 }
 0x15a   : > { %714 = vmatprep.subr.mxu1 %v1206_v4 }
 0x15b   : > { %v484_v33 = vpop.permute.xlu0 %483  ;;  %v480_v34 = vpop.permute.xlu1 %479 }
 0x15c   : > { %v533_v37 = vsel %vm519_vm1, %v482_v30, %v484_v33  ;;  %v532_v38 = vsel %vm519_vm1, %v480_v34, %v482_v30 }
 0x15d   : > { %639 = vmatprep.subr.mxu0 %v533_v37 }
 0x15e   : > { %640 = vmatpush2.msra.mxu0 %v532_v38 }
 0x15f   : > { %v494_v39 = vpop.permute.xlu0 %493  ;;  %v474_v0 = vpop.permute.xlu1 %473 }
 0x160   : > { %v537_v40 = vsel %vm519_vm1, %v492_v20, %v494_v39 }
 0x161   : > { %715 = vmatpush2.msra.mxu1 %v537_v40 }
 0x162   : > { %716 = vmatprep.subr.mxu1 %v1206_v4 }
 0x163   : > { %v476_v41 = vpop.permute.xlu0 %475  ;;  %v472_v42 = vpop.permute.xlu1 %471 }
 0x164   : > { %v530_v43 = vsel %vm519_vm1, %v474_v0, %v476_v41  ;;  %v529_v44 = vsel %vm519_vm1, %v472_v42, %v474_v0 }
 0x165   : > { %641 = vmatprep.subr.mxu0 %v530_v43 }
 0x166   : > { %642 = vmatpush2.msra.mxu0 %v529_v44 }
 0x167   : > { %v486_v45 = vpop.permute.xlu0 %485  ;;  %v466_v47 = vpop.permute.xlu1 %465 }
 0x168   : > { %v534_v48 = vsel %vm519_vm1, %v484_v33, %v486_v45 }
 0x169   : > { %717 = vmatpush2.msra.mxu1 %v534_v48 }
 0x16a   : > { %718 = vmatprep.subr.mxu1 %v1206_v4 }
 0x16b   : > { %v468_v51 = vpop.permute.xlu0 %467  ;;  %v464_v52 = vpop.permute.xlu1 %463 }
 0x16c   : > { %v527_v54 = vsel %vm519_vm1, %v466_v47, %v468_v51  ;;  %v526_v55 = vsel %vm519_vm1, %v464_v52, %v466_v47 }
 0x16d   : > { %643 = vmatprep.subr.mxu0 %v527_v54 }
 0x16e   : > { %644 = vmatpush2.msra.mxu0 %v526_v55 }
 0x16f   : > { %v478_v58 = vpop.permute.xlu0 %477  ;;  %v458_v59 = vpop.permute.xlu1 %457 }
 0x170   : > { %v531_v61 = vsel %vm519_vm1, %v476_v41, %v478_v58 }
 0x171   : > { %719 = vmatpush2.msra.mxu1 %v531_v61 }
 0x172   : > { %720 = vmatprep.subr.mxu1 %v1206_v4 }
 0x173   : > { %v460_v62 = vpop.permute.xlu0 %459  ;;  %v456_v63 = vpop.permute.xlu1 %455 }
 0x174   : > { %v524_v5 = vsel %vm519_vm1, %v458_v59, %v460_v62  ;;  %v523_v8 = vsel %vm519_vm1, %v456_v63, %v458_v59 }
 0x175   : > { %645 = vmatprep.subr.mxu0 %v524_v5 }
 0x176   : > { %646 = vmatpush2.msra.mxu0 %v523_v8 }
 0x177   : > { %v470_v9 = vpop.permute.xlu0 %469  ;;  %v450_v10 = vpop.permute.xlu1 %449 }
 0x178   : > { %v528_v11 = vsel %vm519_vm1, %v468_v51, %v470_v9 }
 0x179   : > { %721 = vmatpush2.msra.mxu1 %v528_v11 }
 0x17a   : > { %722 = vmatprep.subr.mxu1 %v1206_v4 }
 0x17b   : > { %v452_v12 = vpop.permute.xlu0 %451  ;;  %v448_v15 = vpop.permute.xlu1 %447 }
 0x17c   : > { %v521_v16 = vsel %vm519_vm1, %v450_v10, %v452_v12  ;;  %v520_v13 = vsel %vm519_vm1, %v448_v15, %v450_v10 }
 0x17d   : > { %647 = vmatprep.subr.mxu0 %v521_v16 }
 0x17e   : > { %648 = vmatpush2.msra.mxu0 %v520_v13 }
 0x17f   : > { %v462_v22 = vpop.permute.xlu0 %461  ;;  %650 = vmatmul.mubr.f32.vlgmr.msra.gmra.mxu0 %v574_v17  ;;  %v454_v14 = vpop.permute.xlu1 %453 }
 0x180   : > { %v525_v25 = vsel %vm519_vm1, %v460_v62, %v462_v22  ;;  %958 = vmatprep.mubr.msk.f32.mxu0 %vm578_vm9, %v577_v18  ;;  %v522_v28 = vsel %vm519_vm1, %v452_v12, %v454_v14 }
 0x181   : > { %723 = vmatpush2.msra.mxu1 %v525_v25 }
 0x182   : > { %724 = vmatprep.subr.mxu1 %v1206_v4 }
 0x183   : > { %656 = vmatmul.mubr.f32.gmra.mxu0 %v576_v21  ;;  %725 = vmatpush2.msra.mxu1 %v522_v28 }
 0x184   : > { %727 = vmatmul.mubr.f32.vlgmr.msra.gmra.mxu1 %v574_v17 }
 0x185   : > { %960 = vmatprep.mubr.msk.f32.mxu1 %vm578_vm9, %v577_v18 }
 0x188   : > { %732 = vmatmul.mubr.f32.gmra.mxu1 %v576_v21 }
 0x23f   : > { %v651_v4 = vpop.f32.mrf.mxu0 }
 0x240   : > { %v1643_v50 = vmul.f32 %v742_v1, %v651_v4 }
 0x241   : > { %v653_v53 = vpop.f32.mrf.mxu0 }
 0x242   : > { %v760_v57 = vmul.f32 %v1643_v50, %v1643_v50  ;;  %v1647_v60 = vmul.f32 %v746_v3, %v653_v53 }
 0x243   : > { %v657_v6 = vpop.f32.mrf.mxu0 }
 0x244   : > { %v763_v7 = vrot.slane %v760_v57, 4  ;;  %v761_v2 = vmul.f32 %v1647_v60, %v1647_v60  ;;  %v1651_v19 = vmul.f32 %v742_v1, %v657_v6  ;;  %v728_v20 = vpop.f32.mrf.mxu1 }
 0x245   : > { %v1653_v23 = vmul.f32 %v750_v56, %v728_v20  ;;  %v659_v24 = vpop.f32.mrf.mxu0 }
 0x246   : > { %v764_v26 = vadd.f32 %v763_v7, %v760_v57  ;;  %v769_v27 = vrot.slane %v761_v2, 4  ;;  %v805_v30 = vmul.f32 %v1651_v19, %v1651_v19  ;;  %v1657_v31 = vmul.f32 %v746_v3, %v659_v24  ;;  %v730_v33 = vpop.f32.mrf.mxu1 }
 0x247   : > { %v762_v34 = vmul.f32 %v1653_v23, %v1653_v23 }
 0x248   : > { %v765_v37 = vrot.slane %v764_v26, 2  ;;  %v770_v38 = vadd.f32 %v769_v27, %v761_v2  ;;  %v808_v39 = vrot.slane %v805_v30, 4  ;;  %v806_v0 = vmul.f32 %v1657_v31, %v1657_v31  ;;  %v733_v40 = vpop.f32.mrf.mxu1 }
 0x249   : > { %v775_v41 = vrot.slane %v762_v34, 4  ;;  %v1663_v42 = vmul.f32 %v750_v56, %v733_v40 }
 0x24a   : > { %v766_v43 = vadd.f32 %v765_v37, %v764_v26  ;;  %v771_v44 = vrot.slane %v770_v38, 2  ;;  %v809_v45 = vadd.f32 %v808_v39, %v805_v30  ;;  %v814_v47 = vrot.slane %v806_v0, 4  ;;  %v735_v48 = vpop.f32.mrf.mxu1 }
 0x24b   : > { %v776_v51 = vadd.f32 %v775_v41, %v762_v34  ;;  %v807_v52 = vmul.f32 %v1663_v42, %v1663_v42 }
 0x24c   : > { %v767_v54 = vrot.slane %v766_v43, 1  ;;  %v772_v55 = vadd.f32 %v771_v44, %v770_v38  ;;  %v810_v58 = vrot.slane %v809_v45, 2  ;;  %v815_v59 = vadd.f32 %v814_v47, %v806_v0 }
 0x24d   : > { %v777_v61 = vrot.slane %v776_v51, 2  ;;  %v820_v62 = vrot.slane %v807_v52, 4 }
 0x24e   : > { %v768_v63 = vadd.f32 %v767_v54, %v766_v43  ;;  %v773_v5 = vrot.slane %v772_v55, 1  ;;  %v811_v8 = vadd.f32 %v810_v58, %v809_v45  ;;  %v816_v9 = vrot.slane %v815_v59, 2 }
 0x24f   : > { %v778_v10 = vadd.f32 %v777_v61, %v776_v51  ;;  %v821_v11 = vadd.f32 %v820_v62, %v807_v52 }
 0x250   : > { %v781_v12 = vadd.f32 1e-09, %v768_v63  ;;  %v790_v15 = vadd.f32 1.0, %v768_v63  ;;  %v774_v16 = vadd.f32 %v773_v5, %v772_v55  ;;  %v812_v13 = vrot.slane %v811_v8, 1 }
 0x251   : > { %v779_v17 = vrot.slane %v778_v10, 1  ;;  %v817_v18 = vadd.f32 %v816_v9, %v815_v59  ;;  %v822_v22 = vrot.slane %v821_v11, 2 }
 0x252   : > { %1046 = vrsqrt.f32 %v781_v12  ;;  %v782_v14 = vadd.f32 1e-09, %v774_v16  ;;  %v791_v25 = vadd.f32 1.0, %v774_v16  ;;  %v813_v21 = vadd.f32 %v812_v13, %v811_v8 }
 0x253   : > { %1048 = vrcp.f32 %v790_v15  ;;  %v780_v28 = vadd.f32 %v779_v17, %v778_v10  ;;  %v818_v29 = vrot.slane %v817_v18, 1  ;;  %v823_v32 = vadd.f32 %v822_v22, %v821_v11 }
 0x254   : > { %1050 = vrsqrt.f32 %v782_v14  ;;  %v826_v35 = vadd.f32 1e-09, %v813_v21  ;;  %v835_v36 = vadd.f32 1.0, %v813_v21 }
 0x255   : > { %1052 = vrcp.f32 %v791_v25  ;;  %v783_v46 = vadd.f32 1e-09, %v780_v28  ;;  %v792_v1 = vadd.f32 1.0, %v780_v28  ;;  %v819_v49 = vadd.f32 %v818_v29, %v817_v18 }
 0x256   : > { %1054 = vrsqrt.f32 %v826_v35  ;;  %v824_v3 = vrot.slane %v823_v32, 1 }
 0x257   : > { %1056 = vrcp.f32 %v835_v36  ;;  %v827_v4 = vadd.f32 1e-09, %v819_v49  ;;  %v836_v53 = vadd.f32 1.0, %v819_v49 }
 0x258   : > { %1058 = vrsqrt.f32 %v783_v46  ;;  %v825_v56 = vadd.f32 %v824_v3, %v823_v32 }
 0x259   : > { %1060 = vrcp.f32 %v792_v1 }
 0x25a   : > { %1062 = vrsqrt.f32 %v827_v4  ;;  %v828_v57 = vadd.f32 1e-09, %v825_v56  ;;  %v837_v6 = vadd.f32 1.0, %v825_v56 }
 0x25b   : > { %1064 = vrcp.f32 %v836_v53 }
 0x25c   : > { %1066 = vrsqrt.f32 %v828_v57 }
 0x25d   : > { %1068 = vrcp.f32 %v837_v6 }
 0x25f   : > { %v1047_v7 = vpop.eup %1046 }
 0x260   : > { %v1049_v2 = vpop.eup %1048  ;;  %v787_v20 = vmul.f32 %v1047_v7, %v768_v63 }
 0x261   : > { %v1051_v24 = vpop.eup %1050 }
 0x262   : > { %v1053_v26 = vpop.eup %1052  ;;  %v796_v27 = vmul.f32 %v1049_v2, %v787_v20  ;;  %v788_v30 = vmul.f32 %v1051_v24, %v774_v16 }
 0x263   : > { %v1055_v33 = vpop.eup %1054 }
 0x264   : > { %v1057_v34 = vpop.eup %1056  ;;  %v799_v37 = vmul.f32 %v796_v27, %v1643_v50  ;;  %v797_v38 = vmul.f32 %v1053_v26, %v788_v30  ;;  %v832_v39 = vmul.f32 %v1055_v33, %v813_v21 }
 0x265   : > { %v1059_v0 = vpop.eup %1058 }
 0x266   : > { %v1061_v40 = vpop.eup %1060  ;;  %802 = vst [vmem:[%s201_s22] sm:$0xff] %v799_v37  ;;  %v800_v41 = vmul.f32 %v797_v38, %v1647_v60  ;;  %v841_v43 = vmul.f32 %v1057_v34, %v832_v39  ;;  %v789_v44 = vmul.f32 %v1059_v0, %v780_v28 }
 0x267   : > { %v1063_v45 = vpop.eup %1062 }
 0x268   : > { %v1065_v47 = vpop.eup %1064  ;;  %803 = vst [vmem:[%s201_s22 + $0x8] sm:$0xff] %v800_v41  ;;  %v844_v48 = vmul.f32 %v841_v43, %v1651_v19  ;;  %v798_v51 = vmul.f32 %v1061_v40, %v789_v44  ;;  %v833_v52 = vmul.f32 %v1063_v45, %v819_v49 }
 0x269   : > { %v1067_v54 = vpop.eup %1066 }
 0x26a   : > { %847 = vst [vmem:[%s201_s22 + $0x18] sm:$0xff] %v844_v48  ;;  %v801_v50 = vmul.f32 %v798_v51, %v1653_v23  ;;  %v842_v55 = vmul.f32 %v1065_v47, %v833_v52  ;;  %v834_v58 = vmul.f32 %v1067_v54, %v825_v56  ;;  %v1069_v60 = vpop.eup %1068 }
 0x26c   : > { %804 = vst [vmem:[%s201_s22 + $0x10] sm:$0xff] %v801_v50  ;;  %v845_v19 = vmul.f32 %v842_v55, %v1657_v31  ;;  %v843_v59 = vmul.f32 %v1069_v60, %v834_v58 }
 0x26e   : > { %848 = vst [vmem:[%s201_s22 + $0x20] sm:$0xff] %v845_v19  ;;  %v846_v61 = vmul.f32 %v843_v59, %v1663_v42 }
 0x270   : > { %849 = vst [vmem:[%s201_s22 + $0x28] sm:$0xff] %v846_v61 }
 0x271   : > { %1137 = shalt.err (!%p1134_p0)
}
 0x272   : > { %s1138_s10 = scalar_lea.hbm %s1680_s30, 768  ;;  %s1142_s27 = scalar_lea.hbm %s1726_s3, 1536 }
 0x273   : > { %p1139_p5 = scmp.ne.s32.totalorder %s1680_s30, %s1138_s10  ;;  %p1143_p1 = scmp.lt.s32.totalorder %s1680_s30, %s1726_s3 }
 0x274   : > { %p1144_p4 = scmp.lt.s32.totalorder %s1142_s27, %s1138_s10 }
 0x275   : > { %p1140_p9 = pnand %p1139_p5, %p1742_p3 }
 0x276   : > { %p1145_p6 = por %p1144_p4, %p1143_p1 }
 0x277   : > { %p1141_p12 = pneg %p1140_p9 }
 0x279   : > { %p1146_p8 = pnand %p1145_p6, %p1141_p12 }
 0x27b   : > { %1149 = shalt.err (!%p1146_p8)
}
 0x27c   : > { %s1217_s17 = smov 384   ;;  %s1218_s22 = smov 24  }
 0x27d   : > { %973 = dma.vmem_to_hbm [thread:$0]  (%p1742_p3), %s1673_s23, 768, %s1680_s30, %s851_s16, %s1217_s17, %s1217_s17, %s1218_s22  }
 0x27e PF: > { %s879_s25 = sand.u32 1, %s1180_s12   ;;  %p1743_p11 = scmp.ne.s32.totalorder %s1732_s19, 0 }
 0x27f   : > { %p1744_p7 = scmp.ge.s32.totalorder %s1192_s15, 2  ;;  %s880_s28 = scalar_lea.sflag [#allocation4], %s879_s25 }
 0x281   : > { %p984_p10 = pnand %p1744_p7, %p1743_p11 }
 0x283   : > { %p985_p2 = pneg %p984_p10 }
 0x285   : > { %1175 = dma.done.wait (%p985_p2), %s880_s28, 768  }
 0x286   : > { %1177 = vsyncadd (%p985_p2), %s880_s28, 4294966528  ;;  %p17_p13 = scmp.ge.s32.totalorder %s1293_s24, 4   ;;  %s1745_s12 = smov %s1184_s13 }
 0x287   : > { %s1746_s13 = smov %s1188_s14  ;;  %s1747_s14 = smov %s1310_s5 }
 0x288   : > { %s1748_s15 = smov %s1293_s24  ;;  %19 = sbr.rel (!%p17_p13) target bundleno = 6 (0x6), region = 81 }
 0x28d   :  { %885 = vsyncpa [#allocation3], 1 }
 0x28e   :  { %887 = vsyncpa [#allocation3 + $0x1], 1 }
 0x28f   :  { %888 = vsyncpa [#allocation6], 1 }
 0x290   :  { %889 = vsyncpa [#allocation4], 1 }
 0x291   :  { %891 = vsyncpa [#allocation4 + $0x1], 1 }

</bundles_post_ra>
